<compile_context>
chip_gen: v5e
topology: v5e:2x2
jax: 0.10.0
libtpu: 0.0.40
codegen_flags: <defaults>
</compile_context>

<pallas_src>
import jax
import jax.numpy as jnp
import numpy as np
from jax import lax
from jax.experimental import pallas as pl
from jax.experimental.pallas import tpu as pltpu


def _round_up(x, m):
    return ((x + m - 1) // m) * m


# ---------------------------------------------------------------------------
# Generic tiled matmul + bias kernel: y = x @ w + b  (parallel over M and N).
# ---------------------------------------------------------------------------
def _matmul_bias_kernel(x_ref, w_ref, b_ref, o_ref):
    o_ref[...] = (jnp.dot(x_ref[...], w_ref[...],
                          preferred_element_type=jnp.float32)
                  + b_ref[...]).astype(o_ref.dtype)


def matmul_bias(x, w, b, *, block_m=512, block_n=1024):
    """x: (M, K), w: (K, N), b: (1, N) -> (M, N) float32."""
    M, K = x.shape
    N = w.shape[1]

    # M tiling (sublane axis: multiple of 8 when tiled, else full extent).
    if M <= block_m:
        bm, Mp = M, M
    else:
        bm = block_m
        Mp = _round_up(M, bm)
    # N tiling (lane axis: multiple of 128 when tiled, else full extent).
    if N <= block_n:
        bn, Np = N, N
    else:
        bn = block_n
        Np = _round_up(N, bn)

    if Mp != M:
        x = jnp.pad(x, ((0, Mp - M), (0, 0)))
    if Np != N:
        w = jnp.pad(w, ((0, 0), (0, Np - N)))
        b = jnp.pad(b, ((0, 0), (0, Np - N)))

    out = pl.pallas_call(
        _matmul_bias_kernel,
        out_shape=jax.ShapeDtypeStruct((Mp, Np), jnp.float32),
        grid_spec=pltpu.PrefetchScalarGridSpec(
            num_scalar_prefetch=0,
            grid=(Mp // bm, Np // bn),
            in_specs=[pl.BlockSpec((bm, K), lambda i, j: (i, 0)),
                      pl.BlockSpec((K, bn), lambda i, j: (0, j)),
                      pl.BlockSpec((1, bn), lambda i, j: (0, j))],
            out_specs=pl.BlockSpec((bm, bn), lambda i, j: (i, j))),
        compiler_params=pltpu.CompilerParams(
            dimension_semantics=("parallel", "parallel")),
    )(x, w, b)
    if Mp != M or Np != N:
        out = out[:M, :N]
    return out


# ---------------------------------------------------------------------------
# Serial GRU recurrence kernel (time loop inside the kernel).
# ---------------------------------------------------------------------------
def _gru_recurrence_kernel(feat_ref, xproj_ref, w_zr_ref, w_hh_ref, h_out_ref):
    """xproj = x @ [Wzx|Wrx|Whx] + [bz|br|bh], shape (S, B, 3H).

    Per step only the h-dependent work remains:
        zr      = sigmoid(xproj[t, :, :2H] + h @ [Wzh|Wrh])
        h_tilde = tanh   (xproj[t, :, 2H:] + (r*h) @ Whh)
        h       = h + z * (h_tilde - h)
    All hidden states are written to h_out (S, B, H); fc_out is applied
    afterwards as one batched, fully-parallel matmul.
    """
    S = xproj_ref.shape[0]
    H = feat_ref.shape[1]

    def step(t, h):
        xp = xproj_ref[t]                                     # (B, 3H)
        zr = jax.nn.sigmoid(
            xp[:, : 2 * H]
            + jnp.dot(h, w_zr_ref[...], preferred_element_type=jnp.float32))
        z = zr[:, :H]
        r = zr[:, H:]
        h_tilde = jnp.tanh(
            xp[:, 2 * H:]
            + jnp.dot(r * h, w_hh_ref[...],
                      preferred_element_type=jnp.float32))
        h_new = h + z * (h_tilde - h)
        h_out_ref[t] = h_new
        return h_new

    lax.fori_loop(0, S, step, feat_ref[...], unroll=(S <= 16))


# ---------------------------------------------------------------------------
# Forward wrapper.
# ---------------------------------------------------------------------------
def decoder_gru_forward(features, captions, params):
    """features: (B, H) f32, captions: (B, S) int32 -> (B, S, V) f32."""
    emb_w = params["embedding"]                     # (V, E)
    B, S = captions.shape
    E = emb_w.shape[1]
    H = features.shape[1]
    V = params["wo"].shape[1]

    # Fused weights: x-path (E, 3H) ordered [z|r|h]; h-path z/r fused (H, 2H).
    w_x3 = jnp.concatenate([params["wzx"], params["wrx"], params["whx"]], axis=1)
    b_3 = jnp.concatenate([params["bz"], params["br"], params["bh"]], axis=1)
    w_zr = jnp.concatenate([params["wzh"], params["wrh"]], axis=1)
    w_hh = params["whh"]

    # Embedding lookup is glue (pure gather); gather time-major directly so no
    # extra transpose pass is needed.  All matmuls are in Pallas.
    emb_t = jnp.take(emb_w, captions.T, axis=0)     # (S, B, E) time-major

    # (1) Hoisted x-projection: one large matmul over all S*B rows, biases
    #     folded in so the recurrence has no per-step broadcasts.
    x_proj = matmul_bias(emb_t.reshape(S * B, E), w_x3, b_3)
    x_proj = x_proj.reshape(S, B, 3 * H)

    # (2) Serial recurrence: single pallas_call, everything VMEM-resident,
    #     lax.fori_loop over time inside the kernel.
    h_slab = pl.pallas_call(
        _gru_recurrence_kernel,
        out_shape=jax.ShapeDtypeStruct((S, B, H), jnp.float32),
    )(features, x_proj, w_zr, w_hh)

    # (3) Hoisted fc_out: one batched matmul for the whole logits slab.
    logits = matmul_bias(h_slab.reshape(S * B, H), params["wo"], params["bo"])
    logits = logits.reshape(S, B, V)
    return jnp.transpose(logits, (1, 0, 2))         # (B, S, V) as in PyTorch


# ---------------------------------------------------------------------------
# Pure-JAX reference mirroring the (intended) PyTorch forward.
# ---------------------------------------------------------------------------
def decoder_gru_reference(features, captions, params):
    emb = jnp.take(params["embedding"], captions, axis=0)
    S = emb.shape[1]
    h = features
    outs = []
    for t in range(S):
        x = emb[:, t, :]
        z = jax.nn.sigmoid(x @ params["wzx"] + h @ params["wzh"] + params["bz"])
        r = jax.nn.sigmoid(x @ params["wrx"] + h @ params["wrh"] + params["br"])
        h_tilde = jnp.tanh(x @ params["whx"] + (r * h) @ params["whh"] + params["bh"])
        h = (1.0 - z) * h + z * h_tilde
        outs.append(h @ params["wo"] + params["bo"])
    return jnp.stack(outs, axis=1)


def init_params(key, embed_size, hidden_size, vocab_size):
    E, H, V = embed_size, hidden_size, vocab_size
    ks = jax.random.split(key, 9)
    scale = 0.1
    return {
        "embedding": scale * jax.random.normal(ks[0], (V, E), jnp.float32),
        # Wz / Wr / Wh : nn.Linear(E+H, H), split into x- and h- halves, transposed.
        "wzx": scale * jax.random.normal(ks[1], (E, H), jnp.float32),
        "wzh": scale * jax.random.normal(ks[2], (H, H), jnp.float32),
        "bz": scale * jax.random.normal(ks[3], (1, H), jnp.float32),
        "wrx": scale * jax.random.normal(ks[4], (E, H), jnp.float32),
        "wrh": scale * jax.random.normal(ks[5], (H, H), jnp.float32),
        "br": scale * jax.random.normal(ks[6], (1, H), jnp.float32),
        "whx": scale * jax.random.normal(ks[7], (E, H), jnp.float32),
        "whh": scale * jax.random.normal(ks[8], (H, H), jnp.float32),
        "bh": jnp.zeros((1, H), jnp.float32),
        # fc_out : nn.Linear(H, V), transposed.
        "wo": scale * jax.random.normal(jax.random.fold_in(key, 100), (H, V), jnp.float32),
        "bo": jnp.zeros((1, V), jnp.float32),
    }


if __name__ == "__main__":
    B, S, E, H, V = 2, 8, 32, 32, 64

    key = jax.random.PRNGKey(0)
    k_feat, k_cap, k_par = jax.random.split(key, 3)

    features = jax.random.normal(k_feat, (B, H), jnp.float32)      # initial hidden
    captions = jax.random.randint(k_cap, (B, S), 0, V, jnp.int32)  # token ids
    params = init_params(k_par, E, H, V)

    out = decoder_gru_forward(features, captions, params)
    out = jax.block_until_ready(out)

    ref = decoder_gru_reference(features, captions, params)
    assert out.shape == (B, S, V), out.shape
    np.testing.assert_allclose(np.asarray(out), np.asarray(ref), rtol=1e-5, atol=1e-5)

    print("KERNEL_OK")
</pallas_src>

<mosaic_0001>
module attributes {stable_mosaic.version = 11 : i64} {
  func.func @_matmul_bias_kernel(%arg0: i32, %arg1: i32, %arg2: memref<16x32xf32, #tpu.memory_space<vmem>>, %arg3: memref<32x96xf32, #tpu.memory_space<vmem>>, %arg4: memref<1x96xf32, #tpu.memory_space<vmem>>, %arg5: memref<16x96xf32, #tpu.memory_space<vmem>>) attributes {dimension_semantics = [#tpu.dimension_semantics<parallel>, #tpu.dimension_semantics<parallel>], iteration_bounds = array<i64: 1, 1>, scalar_prefetch = 0 : i64, scratch_operands = 0 : i64, tpu.core_type = #tpu.core_type<tc>, window_params = [{transform_indices = @transform_0, window_bounds = array<i64: 16, 32>}, {transform_indices = @transform_1, window_bounds = array<i64: 32, 96>}, {transform_indices = @transform_2, window_bounds = array<i64: 1, 96>}, {transform_indices = @transform_3, window_bounds = array<i64: 16, 96>}]} {
    %c0 = arith.constant 0 : index
    %c0_0 = arith.constant 0 : index
    %0 = vector.load %arg2[%c0, %c0_0] : memref<16x32xf32, #tpu.memory_space<vmem>>, vector<16x32xf32>
    %c0_1 = arith.constant 0 : index
    %c0_2 = arith.constant 0 : index
    %1 = vector.load %arg3[%c0_1, %c0_2] : memref<32x96xf32, #tpu.memory_space<vmem>>, vector<32x96xf32>
    %cst = arith.constant dense<0.000000e+00> : vector<16x96xf32>
    %2 = tpu.matmul %0, %1, %cst {dimension_numbers = #tpu.dot_dimension_numbers<[1], [0], [0], [1], [0, 0, 1, 1], [], []>} : vector<16x32xf32>, vector<32x96xf32>, vector<16x96xf32> -> vector<16x96xf32>
    %c0_3 = arith.constant 0 : index
    %c0_4 = arith.constant 0 : index
    %3 = vector.load %arg4[%c0_3, %c0_4] : memref<1x96xf32, #tpu.memory_space<vmem>>, vector<1x96xf32>
    %4 = vector.broadcast %3 : vector<1x96xf32> to vector<16x96xf32>
    %5 = arith.addf %2, %4 : vector<16x96xf32>
    %c0_5 = arith.constant 0 : index
    %c0_6 = arith.constant 0 : index
    %6 = vector.load %arg5[%c0_5, %c0_6] : memref<16x96xf32, #tpu.memory_space<vmem>>, vector<16x96xf32>
    tpu.vector_store %arg5[%c0_5, %c0_6], %5 {strides = array<i32>} : memref<16x96xf32, #tpu.memory_space<vmem>>, vector<16x96xf32>,
    return
  }
  func.func @transform_0(%arg0: i32, %arg1: i32) -> (i32, i32) {
    %c0_i32 = arith.constant 0 : i32
    %c0_i32_0 = arith.constant 0 : i32
    return %arg0, %c0_i32 : i32, i32
  }
  func.func @transform_1(%arg0: i32, %arg1: i32) -> (i32, i32) {
    %c0_i32 = arith.constant 0 : i32
    %c0_i32_0 = arith.constant 0 : i32
    return %c0_i32, %arg1 : i32, i32
  }
  func.func @transform_2(%arg0: i32, %arg1: i32) -> (i32, i32) {
    %c0_i32 = arith.constant 0 : i32
    %c0_i32_0 = arith.constant 0 : i32
    return %c0_i32, %arg1 : i32, i32
  }
  func.func @transform_3(%arg0: i32, %arg1: i32) -> (i32, i32) {
    %c0_i32 = arith.constant 0 : i32
    return %arg0, %arg1 : i32, i32
  }
}

</mosaic_0001>

<bundles_post_ra>
// kernel: tpu_custom_call.1
= control target key start
LH: loop header
LB: loop body
LE: loop exit
PB: predicated region body
PF: predicated region fallthrough
CT: control target
= control target key end

     0   :  { %8 = vsyncpa [#allocation3], 0  ;;  %s246_s0 = inlined_call_operand.hbm [shape: f32[16,32], index: 0, kind: input, shape index: {}]   ;;  %s247_s1 = inlined_call_operand.hbm [shape: f32[32,96], index: 1, kind: input, shape index: {}]   ;;  %s248_s2 = inlined_call_operand.vmem [shape: f32[1,96], index: 2, kind: input, shape index: {}]   ;;  %s249_s3 = inlined_call_operand.hbm [shape: f32[16,96], index: 3, kind: output, shape index: {}]  }
   0x1   :  { %9 = vsyncpa [#allocation6], 0 }
   0x2   :  { %10 = vsyncpa [#allocation4], 0  ;;  %s15_s14 = sshll.u32 %s246_s0, 4  ;;  %s200_s15 = smov [#allocation2]   ;;  %s16_s14 = int_to_ptr.hbm [resolvable:$true] %s15_s14 }
   0x3   :  { %s17_s16 = sshll.u32 %s200_s15, 4  ;;  %s28_s19 = sshll.u32 %s247_s1, 4  ;;  %s18_s16 = int_to_ptr.vmem [resolvable:$true] %s17_s16  ;;  %s29_s19 = int_to_ptr.hbm [resolvable:$true] %s28_s19 }
   0x4   :  { %s201_s20 = smov 128   ;;  %s202_s21 = smov 8  }
   0x5   :  { %23 = dma.hbm_to_vmem [thread:$0]  %s16_s14, 256, %s18_s16, [#allocation3], %s201_s20, %s201_s20, %s202_s21  }
   0x6   :  { %s203_s22 = smov [#allocation5]  }
   0x7   :  { %s30_s23 = sshll.u32 %s203_s22, 4  ;;  %s31_s23 = int_to_ptr.vmem [resolvable:$true] %s30_s23 }
   0x8   :  { %36 = dma.hbm_to_vmem [thread:$0]  %s29_s19, 512, %s31_s23, [#allocation6], %s201_s20, %s201_s20, %s202_s21  }
   0x9   :  { %194 = dma.done.wait [#allocation3], 256  }
   0xa   :  { %195 = vsyncadd [#allocation3], 4294967040 }
   0xb   :  { %196 = dma.done.wait [#allocation6], 512  }
   0xc   :  { %197 = vsyncadd [#allocation6], 4294966784  ;;  %v52_v0 = vld [vmem:[#allocation5 + $0x18] sm:$0xff]  ;;  %v51_v1 = vld [vmem:[#allocation5 + $0x10] sm:$0xff]  ;;  %vm57_vm0 = vcmask 261120   ;;  %s204_s24 = smov [#allocation7]  }
   0xd   :  { %76 = vmatpush.msra.mxu0 %v52_v0  ;;  %112 = vmatpush.msra.mxu1 %v52_v0  ;;  %v50_v2 = vld [vmem:[#allocation5 + $0x8] sm:$0xff]  ;;  %v49_v3 = vld [vmem:[#allocation5] sm:$0xff]  ;;  %v47_v4 = vld [vmem:[#allocation2] sm:$0xff]  ;;  %s94_s25 = sshll.u32 %s204_s24, 4  ;;  %s96_s28 = sshll.u32 %s249_s3, 4  ;;  %vm87_vm1 = vcmask 785408   ;;  %s95_s25 = int_to_ptr.vmem [resolvable:$true] %s94_s25  ;;  %s97_s28 = int_to_ptr.hbm [resolvable:$true] %s96_s28 }
   0xe   :  { %v48_v5 = vld [vmem:[#allocation2 + $0x8] sm:$0xff]  ;;  %v121_v6 = vld [vmem:[%s248_s2] ss:$0 sm:$0xff] }
   0xf   :  { %77 = vmatpush.msra.mxu0 %v51_v1  ;;  %113 = vmatpush.msra.mxu1 %v51_v1 }
  0x11   :  { %78 = vmatpush.msra.mxu0 %v50_v2  ;;  %114 = vmatpush.msra.mxu1 %v50_v2 }
  0x13   :  { %79 = vmatpush.msra.mxu0 %v49_v3  ;;  %115 = vmatpush.msra.mxu1 %v49_v3 }
  0x14   :  { %110 = vmatmul.msk.f32.vlgmr.msra.gmra.mxu0 %vm57_vm0, %v47_v4  ;;  %111 = vmatmul.msk.f32.vlgmr.msra.gmra.mxu1 %vm57_vm0, %v48_v5 }
  0x91   :  { %v81_v7 = vpop.f32.mrf.mxu0  ;;  %v84_v8 = vpop.f32.mrf.mxu1 }
  0x92   :  { %v82_v9 = vadd.f32 %v121_v6, %v81_v7  ;;  %v85_v10 = vadd.f32 %v121_v6, %v84_v8 }
  0x94   :  { %88 = vst.msk [vmem:[#allocation7] sm:$0xff] %vm87_vm1, %v82_v9 }
  0x95   :  { %89 = vst.msk [vmem:[#allocation7 + $0x8] sm:$0xff] %vm87_vm1, %v85_v10 }
  0x96   :  { %102 = dma.vmem_to_hbm [thread:$0]  %s95_s25, 256, %s97_s28, [#allocation4], %s201_s20, %s201_s20, %s202_s21  }
  0x97   :  { %198 = dma.done.wait [#allocation4], 256  }
  0x98   :  { %199 = vsyncadd [#allocation4], 4294967040 }
  0x99   :  { %107 = vsyncpa [#allocation3], 1 }
  0x9a   :  { %108 = vsyncpa [#allocation6], 1 }
  0x9b   :  { %109 = vsyncpa [#allocation4], 1 }

</bundles_post_ra>
